<compile_context>
chip_gen: v7x
topology: tpu7x:2x2x1
jax: 0.10.0
libtpu: 0.0.40
codegen_flags: <defaults>
</compile_context>

<pallas_src>
import functools
import math

import jax
import jax.numpy as jnp
from jax.experimental import pallas as pl
from jax.experimental.pallas import tpu as pltpu

BN_EPS = 1e-5            # nn.BatchNorm1d default eps
L2_EPS = 1e-12           # F.normalize default eps
C5 = 1500                # conv5 output channels (fixed by the architecture)
C5P = 1536               # padded to a multiple of 128: lane-dense vregs / unmasked MXU tiles


def _vmem_limit_bytes():
    # Generation-aware scoped-VMEM limit: ~48 MiB on v7x (64 MiB physical),
    # 64 MiB on v5e/v6e (128 MiB physical).  Conservative fallback: 32 MiB.
    try:
        cap = pltpu.get_tpu_info().vmem_capacity_bytes
        return int(min(cap - (16 << 20), 64 << 20))
    except Exception:
        return 32 << 20


VMEM_LIMIT = _vmem_limit_bytes()


def _const_spec(shape):
    """BlockSpec for a grid-invariant (weight) input: constant index map, single buffer."""
    ndim = len(shape)
    idx = lambda *args, _n=ndim: (0,) * _n
    try:
        return pl.BlockSpec(shape, idx, pipeline_mode=pl.Buffered(1))
    except (AttributeError, TypeError):          # older jax without pipeline_mode
        return pl.BlockSpec(shape, idx)


# --------------------------- Kernel A: fused dilated conv stack ---------------------------
def _conv_stack_kernel(x_ref,
                       w1_ref, sh1_ref,
                       w2_ref, sh2_ref,
                       w3_ref, sh3_ref,
                       o_ref, *, cfg):
    """Three dilated Conv1d + BN(eval) + ReLU layers fused, whole time axis per batch.

    The K shifted time-slices are concatenated along channels (in bf16) and
    contracted against the packed (K*C_in, C_out) weight -- BN scale already folded
    into the weight columns -- in a single bf16 dot per layer (f32 accumulate).
    """
    h = x_ref[0]                                            # (T, C_in) bf16 carry
    layers = ((w1_ref, sh1_ref), (w2_ref, sh2_ref), (w3_ref, sh3_ref))
    for (w_ref, sh_ref), (k, dil) in zip(layers, cfg):
        t_out = h.shape[0] - (k - 1) * dil
        taps = [h[kk * dil: kk * dil + t_out, :] for kk in range(k)]
        hk = taps[0] if k == 1 else jnp.concatenate(taps, axis=1)   # (t_out, K*C_in) bf16
        a = jnp.dot(hk, w_ref[...], preferred_element_type=jnp.float32)
        a = jnp.maximum(a + sh_ref[...], 0.0)               # folded-BN shift + ReLU (f32)
        h = a.astype(jnp.bfloat16)
    o_ref[0] = h


def conv_stack(x, layers):
    """x: (B, T, C_in) bf16.

    layers: [(w_packed bf16 (K*C_in, C_out) with BN scale folded in, shift (1,C_out) f32,
              K, dilation)].
    """
    B, T, C_in = x.shape
    t_out = T
    for (_, _, k, d) in layers:
        t_out -= (k - 1) * d
    c_out = layers[-1][0].shape[1]

    # TODO(synk): for very long utterances on v7x (64 MiB VMEM) add time tiling with an
    #             18-frame halo (receptive field of the 3 layers) instead of grid=(B,).
    args = [x]
    in_specs = [pl.BlockSpec((1, T, C_in), lambda b: (b, 0, 0))]
    for (w, sh, _, _) in layers:
        args += [w, sh]
        in_specs += [_const_spec(w.shape), _const_spec(sh.shape)]

    kernel = functools.partial(_conv_stack_kernel,
                               cfg=tuple((k, d) for (_, _, k, d) in layers))
    return pl.pallas_call(
        kernel,
        out_shape=jax.ShapeDtypeStruct((B, t_out, c_out), jnp.bfloat16),
        grid=(B,),
        in_specs=in_specs,
        out_specs=pl.BlockSpec((1, t_out, c_out), lambda b: (b, 0, 0)),
        compiler_params=pltpu.CompilerParams(
            dimension_semantics=("parallel",),
            vmem_limit_bytes=VMEM_LIMIT),
    )(*args)


# --------------------------- Kernel B: 1x1 convs + streaming stat pool + head ---------------------------
def _tail_kernel(h_ref, w4_ref, sh4_ref,
                 w5_ref, sh5c_ref,
                 w5m_ref, w5s_ref, b5_ref,
                 sc6_ref, sh6_ref, w7_ref, b7_ref,
                 o_ref, s_acc, q_acc, *, t_total, tile_t, ragged):
    t = pl.program_id(1)

    # ---- conv4 (1x1, W->W): BN scale folded into weight; shift + ReLU -------------
    a4 = jnp.dot(h_ref[0], w4_ref[...], preferred_element_type=jnp.float32)
    a4 = jnp.maximum(a4 + sh4_ref[...], 0.0).astype(jnp.bfloat16)

    # ---- conv5 (1x1, W->1536 padded): folded scale; shift + ReLU ------------------
    a5 = jnp.dot(a4, w5_ref[...], preferred_element_type=jnp.float32)
    a5 = jnp.maximum(a5 + sh5c_ref[...], 0.0)               # (tile_t, C5P) f32

    @pl.when(t == 0)
    def _():
        s_acc[...] = jnp.zeros_like(s_acc)
        q_acc[...] = jnp.zeros_like(q_acc)

    # ---- streaming pooling: f32 sum / sum-of-squares accumulators -----------------
    # Mask is only paid on the ragged last tile (static flag).
    if ragged:
        is_last = t == pl.num_programs(1) - 1

        @pl.when(jnp.logical_not(is_last))
        def _():
            s_acc[...] += jnp.sum(a5, axis=0, keepdims=True)
            q_acc[...] += jnp.sum(a5 * a5, axis=0, keepdims=True)

        @pl.when(is_last)
        def _():
            row = t * tile_t + jax.lax.broadcasted_iota(jnp.int32, (tile_t, 1), 0)
            m = jnp.where(row < t_total, a5, 0.0)
            s_acc[...] += jnp.sum(m, axis=0, keepdims=True)
            q_acc[...] += jnp.sum(m * m, axis=0, keepdims=True)
    else:
        s_acc[...] += jnp.sum(a5, axis=0, keepdims=True)
        q_acc[...] += jnp.sum(a5 * a5, axis=0, keepdims=True)

    # ---- finalize on the last time tile: pooling -> segment-level head (f32) ------
    @pl.when(t == pl.num_programs(1) - 1)
    def _():
        n = float(t_total)
        mean = s_acc[...] * (1.0 / n)
        # torch.std default: unbiased (n-1); clamp guards sumsq cancellation for long T.
        var = (q_acc[...] - n * mean * mean) / (n - 1.0)
        std = jnp.sqrt(jnp.maximum(var, 0.0))
        # Linear(3000->W) split into mean/std halves; trailing BatchNorm1d(W) already
        # folded into w5m/w5s/b5.  Tiny dots -> keep f32 for full precision.
        x = (jnp.dot(mean, w5m_ref[...], preferred_element_type=jnp.float32)
             + jnp.dot(std, w5s_ref[...], preferred_element_type=jnp.float32)
             + b5_ref[...])
        nrm = jnp.sqrt(jnp.sum(x * x, axis=1, keepdims=True))
        x = x / jnp.maximum(nrm, L2_EPS)                     # F.normalize(p=2, dim=1)
        x = jnp.maximum(x * sc6_ref[...] + sh6_ref[...], 0.0)  # tdnn6_bn (eval) + tdnn6_relu
        o_ref[0] = (jnp.dot(x, w7_ref[...], preferred_element_type=jnp.float32)
                    + b7_ref[...])                           # tdnn7_affine


def tail_pool_head(h, p, *, tile_t=512):
    """Fused conv4+conv5 (+BN+ReLU), streaming stat-pooling and segment head.

    h: (B, T, W) bf16 frame-level features.  Returns the (B, W) f32 embedding.
    """
    B, T, W = h.shape
    if T <= tile_t:
        tile_t, n_t = T, 1                                   # full-dim time block
    else:
        tile_t = max(16, (min(tile_t, T) // 16) * 16)        # multiple of 16 (bf16 sublanes)
        n_t = pl.cdiv(T, tile_t)
    ragged = (n_t > 1) and (T % tile_t != 0)

    args = (h, p["w4"], p["sh4"],
            p["w5c"], p["sh5c"],
            p["w5m"], p["w5s"], p["b5"],
            p["sc6"], p["sh6"], p["w7"], p["b7"])

    in_specs = [pl.BlockSpec((1, tile_t, W), lambda b, t: (b, t, 0))]
    in_specs += [_const_spec(a.shape) for a in args[1:]]

    n_out = p["w7"].shape[1]
    kernel = functools.partial(_tail_kernel, t_total=T, tile_t=tile_t, ragged=ragged)
    out = pl.pallas_call(
        kernel,
        # 3-D output so the last-two block dims equal the full array dims (lane-dense store).
        out_shape=jax.ShapeDtypeStruct((B, 1, n_out), jnp.float32),
        grid=(B, n_t),                                       # reduction (time) axis last
        in_specs=in_specs,
        out_specs=pl.BlockSpec((1, 1, n_out), lambda b, t: (b, 0, 0)),
        scratch_shapes=[pltpu.VMEM((1, C5P), jnp.float32),   # running sum
                        pltpu.VMEM((1, C5P), jnp.float32)],  # running sum of squares
        compiler_params=pltpu.CompilerParams(
            dimension_semantics=("parallel", "arbitrary"),
            vmem_limit_bytes=VMEM_LIMIT),
    )(*args)
    return out[:, 0, :]


# --------------------------- full forward ---------------------------
def tdnn_xvector_nofc_forward(x4, params):
    # x4: (B, 1, T, in_dim) -- matches torch input; squeeze(1)+permute == our (B,T,C) layout.
    h = x4[:, 0].astype(jnp.bfloat16)                        # bf16 at the pallas_call boundary
    h = conv_stack(h, params["conv_stack"])                  # dilated convs 1-3 (fused)
    # NOTE: torch.std with a single frame (T_out == 1) is NaN; same here (unbiased divisor).
    return tail_pool_head(h, params, tile_t=params.get("tile_t", 512))


if __name__ == "__main__":
    B, T, IN_DIM, W = 2, 58, 16, 64                          # small base_width for the test
    key = jax.random.PRNGKey(0)
    keys = jax.random.split(key, 12)

    def conv_w(k, kk, cin, cout):                            # torch Conv1d init: N(0, sqrt(2/(k*out)))
        return jax.random.normal(k, (kk, cin, cout), jnp.float32) * math.sqrt(2.0 / (kk * cout))

    def lin_w(k, cin, cout):                                 # torch Linear init: N(0, 0.01)
        return jax.random.normal(k, (cin, cout), jnp.float32) * 0.01

    def bn_scale(c):                                         # gamma / sqrt(running_var + eps), eval mode
        return jnp.full((c,), 1.0 / math.sqrt(1.0 + BN_EPS), jnp.float32)

    def bn_shift(c):                                         # beta + (conv_bias - running_mean)*scale == 0 here
        return jnp.zeros((1, c), jnp.float32)

    # frame-level dilated convs: (kernel_size, dilation, C_in, C_out)
    # NOTE: a real PyTorch port must take Conv1d weight (C_out, C_in, K) and use
    #       w.permute(2, 1, 0).reshape(K*C_in, C_out) to match this K-major packing.
    stack_cfg = [(5, 1, IN_DIM, W), (3, 3, W, W), (3, 4, W, W)]
    conv_stack_params = []
    for i, (kk, dil, cin, cout) in enumerate(stack_cfg):
        w = conv_w(keys[i], kk, cin, cout).reshape(kk * cin, cout)
        w = (w * bn_scale(cout)[None, :]).astype(jnp.bfloat16)     # fold BN scale (f32) -> bf16
        conv_stack_params.append((w, bn_shift(cout), kk, dil))

    # 1x1 convs feeding the statistics pooling (fused into the tail kernel); BN scale folded.
    w4 = conv_w(keys[3], 1, W, W).reshape(W, W) * bn_scale(W)[None, :]
    w5 = conv_w(keys[4], 1, W, C5).reshape(W, C5) * bn_scale(C5)[None, :]
    w5c = jnp.pad(w5, ((0, 0), (0, C5P - C5)))               # pad 1500 -> 1536 with zeros (exact)
    sh5c = jnp.pad(bn_shift(C5), ((0, 0), (0, C5P - C5)))    # padded shift MUST stay 0

    # segment-level head: Linear(3000, W) split into mean/std halves; the trailing
    # BatchNorm1d(W) of self.tdnn is folded into the halves' columns and the bias.
    sc5 = bn_scale(W)
    w5m = jnp.pad(lin_w(keys[5], C5, W) * sc5[None, :], ((0, C5P - C5), (0, 0)))
    w5s = jnp.pad(lin_w(keys[6], C5, W) * sc5[None, :], ((0, C5P - C5), (0, 0)))
    b5 = jnp.zeros((1, W), jnp.float32) * sc5[None, :] + bn_shift(W)
    w7 = lin_w(keys[7], W, W)

    params = dict(
        conv_stack=conv_stack_params,
        w4=w4.astype(jnp.bfloat16), sh4=bn_shift(W),
        w5c=w5c.astype(jnp.bfloat16), sh5c=sh5c,
        w5m=w5m, w5s=w5s, b5=b5,                             # f32: tiny head dots at full precision
        sc6=bn_scale(W)[None, :], sh6=bn_shift(W),
        w7=w7, b7=jnp.zeros((1, W), jnp.float32),
        tile_t=16,                                           # small tile: exercises streaming + ragged last tile
    )
    # tdnn7_bn / tdnn7_relu / tdnn8_last / classifier exist in __init__ but are unused in forward().

    x4 = jax.random.normal(keys[8], (B, 1, T, IN_DIM), jnp.float32)

    out = tdnn_xvector_nofc_forward(x4, params)
    jax.block_until_ready(out)
    assert out.shape == (B, W) and out.dtype == jnp.float32
    assert bool(jnp.all(jnp.isfinite(out)))
    print("KERNEL_OK")
</pallas_src>

<mosaic_0001>
module attributes {stable_mosaic.version = 11 : i64} {
  func.func @_conv_stack_kernel(%arg0: i32, %arg1: memref<1x58x16xbf16, #tpu.memory_space<vmem>>, %arg2: memref<80x64xbf16, #tpu.memory_space<vmem>>, %arg3: memref<1x64xf32, #tpu.memory_space<vmem>>, %arg4: memref<192x64xbf16, #tpu.memory_space<vmem>>, %arg5: memref<1x64xf32, #tpu.memory_space<vmem>>, %arg6: memref<192x64xbf16, #tpu.memory_space<vmem>>, %arg7: memref<1x64xf32, #tpu.memory_space<vmem>>, %arg8: memref<1x40x64xbf16, #tpu.memory_space<vmem>>) attributes {dimension_semantics = [#tpu.dimension_semantics<parallel>], iteration_bounds = array<i64: 2>, scalar_prefetch = 0 : i64, scratch_operands = 0 : i64, tpu.core_type = #tpu.core_type<tc>, window_params = [{transform_indices = @transform_0, window_bounds = array<i64: 1, 58, 16>}, {pipeline_mode = #tpu.pipeline_mode<synchronous>, transform_indices = @transform_1, window_bounds = array<i64: 80, 64>}, {pipeline_mode = #tpu.pipeline_mode<synchronous>, transform_indices = @transform_2, window_bounds = array<i64: 1, 64>}, {pipeline_mode = #tpu.pipeline_mode<synchronous>, transform_indices = @transform_3, window_bounds = array<i64: 192, 64>}, {pipeline_mode = #tpu.pipeline_mode<synchronous>, transform_indices = @transform_4, window_bounds = array<i64: 1, 64>}, {pipeline_mode = #tpu.pipeline_mode<synchronous>, transform_indices = @transform_5, window_bounds = array<i64: 192, 64>}, {pipeline_mode = #tpu.pipeline_mode<synchronous>, transform_indices = @transform_6, window_bounds = array<i64: 1, 64>}, {transform_indices = @transform_7, window_bounds = array<i64: 1, 40, 64>}]} {
    %c0 = arith.constant 0 : index
    %c0_0 = arith.constant 0 : index
    %c0_1 = arith.constant 0 : index
    %0 = vector.load %arg1[%c0, %c0_0, %c0_1] : memref<1x58x16xbf16, #tpu.memory_space<vmem>>, vector<1x58x16xbf16>
    %1 = vector.shape_cast %0 : vector<1x58x16xbf16> to vector<58x16xbf16>
    %2 = vector.extract_strided_slice %1 {offsets = [0, 0], sizes = [54, 16], strides = [1, 1]} : vector<58x16xbf16> to vector<54x16xbf16>
    %3 = vector.extract_strided_slice %1 {offsets = [1, 0], sizes = [54, 16], strides = [1, 1]} : vector<58x16xbf16> to vector<54x16xbf16>
    %4 = vector.extract_strided_slice %1 {offsets = [2, 0], sizes = [54, 16], strides = [1, 1]} : vector<58x16xbf16> to vector<54x16xbf16>
    %5 = vector.extract_strided_slice %1 {offsets = [3, 0], sizes = [54, 16], strides = [1, 1]} : vector<58x16xbf16> to vector<54x16xbf16>
    %6 = vector.extract_strided_slice %1 {offsets = [4, 0], sizes = [54, 16], strides = [1, 1]} : vector<58x16xbf16> to vector<54x16xbf16>
    %7 = tpu.concatenate %2, %3, %4, %5, %6 in 1 : vector<54x16xbf16>, vector<54x16xbf16>, vector<54x16xbf16>, vector<54x16xbf16>, vector<54x16xbf16> -> vector<54x80xbf16>
    %c0_2 = arith.constant 0 : index
    %c0_3 = arith.constant 0 : index
    %8 = vector.load %arg2[%c0_2, %c0_3] : memref<80x64xbf16, #tpu.memory_space<vmem>>, vector<80x64xbf16>
    %cst = arith.constant dense<0.000000e+00> : vector<54x64xf32>
    %9 = tpu.matmul %7, %8, %cst {dimension_numbers = #tpu.dot_dimension_numbers<[1], [0], [0], [1], [0, 0, 1, 1], [], []>} : vector<54x80xbf16>, vector<80x64xbf16>, vector<54x64xf32> -> vector<54x64xf32>
    %c0_4 = arith.constant 0 : index
    %c0_5 = arith.constant 0 : index
    %10 = vector.load %arg3[%c0_4, %c0_5] : memref<1x64xf32, #tpu.memory_space<vmem>>, vector<1x64xf32>
    %11 = vector.broadcast %10 : vector<1x64xf32> to vector<54x64xf32>
    %12 = arith.addf %9, %11 : vector<54x64xf32>
    %cst_6 = arith.constant 0.000000e+00 : f32
    %13 = vector.broadcast %cst_6 : f32 to vector<54x64xf32>
    %14 = arith.maximumf %12, %13 : vector<54x64xf32>
    %15 = arith.truncf %14 : vector<54x64xf32> to vector<54x64xbf16>
    %16 = vector.extract_strided_slice %15 {offsets = [0, 0], sizes = [48, 64], strides = [1, 1]} : vector<54x64xbf16> to vector<48x64xbf16>
    %17 = vector.extract_strided_slice %15 {offsets = [3, 0], sizes = [48, 64], strides = [1, 1]} : vector<54x64xbf16> to vector<48x64xbf16>
    %18 = vector.extract_strided_slice %15 {offsets = [6, 0], sizes = [48, 64], strides = [1, 1]} : vector<54x64xbf16> to vector<48x64xbf16>
    %19 = tpu.concatenate %16, %17, %18 in 1 : vector<48x64xbf16>, vector<48x64xbf16>, vector<48x64xbf16> -> vector<48x192xbf16>
    %c0_7 = arith.constant 0 : index
    %c0_8 = arith.constant 0 : index
    %20 = vector.load %arg4[%c0_7, %c0_8] : memref<192x64xbf16, #tpu.memory_space<vmem>>, vector<192x64xbf16>
    %cst_9 = arith.constant dense<0.000000e+00> : vector<48x64xf32>
    %21 = tpu.matmul %19, %20, %cst_9 {dimension_numbers = #tpu.dot_dimension_numbers<[1], [0], [0], [1], [0, 0, 1, 1], [], []>} : vector<48x192xbf16>, vector<192x64xbf16>, vector<48x64xf32> -> vector<48x64xf32>
    %c0_10 = arith.constant 0 : index
    %c0_11 = arith.constant 0 : index
    %22 = vector.load %arg5[%c0_10, %c0_11] : memref<1x64xf32, #tpu.memory_space<vmem>>, vector<1x64xf32>
    %23 = vector.broadcast %22 : vector<1x64xf32> to vector<48x64xf32>
    %24 = arith.addf %21, %23 : vector<48x64xf32>
    %cst_12 = arith.constant 0.000000e+00 : f32
    %25 = vector.broadcast %cst_12 : f32 to vector<48x64xf32>
    %26 = arith.maximumf %24, %25 : vector<48x64xf32>
    %27 = arith.truncf %26 : vector<48x64xf32> to vector<48x64xbf16>
    %28 = vector.extract_strided_slice %27 {offsets = [0, 0], sizes = [40, 64], strides = [1, 1]} : vector<48x64xbf16> to vector<40x64xbf16>
    %29 = vector.extract_strided_slice %27 {offsets = [4, 0], sizes = [40, 64], strides = [1, 1]} : vector<48x64xbf16> to vector<40x64xbf16>
    %30 = vector.extract_strided_slice %27 {offsets = [8, 0], sizes = [40, 64], strides = [1, 1]} : vector<48x64xbf16> to vector<40x64xbf16>
    %31 = tpu.concatenate %28, %29, %30 in 1 : vector<40x64xbf16>, vector<40x64xbf16>, vector<40x64xbf16> -> vector<40x192xbf16>
    %c0_13 = arith.constant 0 : index
    %c0_14 = arith.constant 0 : index
    %32 = vector.load %arg6[%c0_13, %c0_14] : memref<192x64xbf16, #tpu.memory_space<vmem>>, vector<192x64xbf16>
    %cst_15 = arith.constant dense<0.000000e+00> : vector<40x64xf32>
    %33 = tpu.matmul %31, %32, %cst_15 {dimension_numbers = #tpu.dot_dimension_numbers<[1], [0], [0], [1], [0, 0, 1, 1], [], []>} : vector<40x192xbf16>, vector<192x64xbf16>, vector<40x64xf32> -> vector<40x64xf32>
    %c0_16 = arith.constant 0 : index
    %c0_17 = arith.constant 0 : index
    %34 = vector.load %arg7[%c0_16, %c0_17] : memref<1x64xf32, #tpu.memory_space<vmem>>, vector<1x64xf32>
    %35 = vector.broadcast %34 : vector<1x64xf32> to vector<40x64xf32>
    %36 = arith.addf %33, %35 : vector<40x64xf32>
    %cst_18 = arith.constant 0.000000e+00 : f32
    %37 = vector.broadcast %cst_18 : f32 to vector<40x64xf32>
    %38 = arith.maximumf %36, %37 : vector<40x64xf32>
    %39 = arith.truncf %38 : vector<40x64xf32> to vector<40x64xbf16>
    %c0_19 = arith.constant 0 : index
    %c0_20 = arith.constant 0 : index
    %c0_21 = arith.constant 0 : index
    %40 = vector.load %arg8[%c0_19, %c0_20, %c0_21] : memref<1x40x64xbf16, #tpu.memory_space<vmem>>, vector<1x40x64xbf16>
    %41 = vector.shape_cast %40 : vector<1x40x64xbf16> to vector<40x64xbf16>
    %42 = vector.shape_cast %39 : vector<40x64xbf16> to vector<1x40x64xbf16>
    tpu.vector_store %arg8[%c0_19, %c0_20, %c0_21], %42 {strides = array<i32>} : memref<1x40x64xbf16, #tpu.memory_space<vmem>>, vector<1x40x64xbf16>,
    return
  }
  func.func @transform_0(%arg0: i32) -> (i32, i32, i32) {
    %c0_i32 = arith.constant 0 : i32
    %c0_i32_0 = arith.constant 0 : i32
    %c0_i32_1 = arith.constant 0 : i32
    return %arg0, %c0_i32, %c0_i32_0 : i32, i32, i32
  }
  func.func @transform_1(%arg0: i32) -> (i32, i32) {
    %c0_i32 = arith.constant 0 : i32
    %c0_i32_0 = arith.constant 0 : i32
    %c0_i32_1 = arith.constant 0 : i32
    return %c0_i32, %c0_i32_0 : i32, i32
  }
  func.func @transform_2(%arg0: i32) -> (i32, i32) {
    %c0_i32 = arith.constant 0 : i32
    %c0_i32_0 = arith.constant 0 : i32
    %c0_i32_1 = arith.constant 0 : i32
    return %c0_i32, %c0_i32_0 : i32, i32
  }
  func.func @transform_3(%arg0: i32) -> (i32, i32) {
    %c0_i32 = arith.constant 0 : i32
    %c0_i32_0 = arith.constant 0 : i32
    %c0_i32_1 = arith.constant 0 : i32
    return %c0_i32, %c0_i32_0 : i32, i32
  }
  func.func @transform_4(%arg0: i32) -> (i32, i32) {
    %c0_i32 = arith.constant 0 : i32
    %c0_i32_0 = arith.constant 0 : i32
    %c0_i32_1 = arith.constant 0 : i32
    return %c0_i32, %c0_i32_0 : i32, i32
  }
  func.func @transform_5(%arg0: i32) -> (i32, i32) {
    %c0_i32 = arith.constant 0 : i32
    %c0_i32_0 = arith.constant 0 : i32
    %c0_i32_1 = arith.constant 0 : i32
    return %c0_i32, %c0_i32_0 : i32, i32
  }
  func.func @transform_6(%arg0: i32) -> (i32, i32) {
    %c0_i32 = arith.constant 0 : i32
    %c0_i32_0 = arith.constant 0 : i32
    %c0_i32_1 = arith.constant 0 : i32
    return %c0_i32, %c0_i32_0 : i32, i32
  }
  func.func @transform_7(%arg0: i32) -> (i32, i32, i32) {
    %c0_i32 = arith.constant 0 : i32
    %c0_i32_0 = arith.constant 0 : i32
    %c0_i32_1 = arith.constant 0 : i32
    return %arg0, %c0_i32, %c0_i32_0 : i32, i32, i32
  }
}

</mosaic_0001>

<bundles_post_ra>
// kernel: tpu_custom_call.1
= control target key start
LH: loop header
LB: loop body
LE: loop exit
PB: predicated region body
PF: predicated region fallthrough
CT: control target
= control target key end

     0   :  { %12 = vsyncpa [#allocation3], 0  ;;  %s1757_s0 = inlined_call_operand.vmem [shape: bf16[2,58,16], index: 0, kind: input, shape index: {}]   ;;  %s1758_s1 = inlined_call_operand.vmem [shape: bf16[80,64], index: 1, kind: input, shape index: {}]   ;;  %s1759_s2 = inlined_call_operand.vmem [shape: f32[1,64], index: 2, kind: input, shape index: {}]   ;;  %s1760_s3 = inlined_call_operand.vmem [shape: bf16[192,64], index: 3, kind: input, shape index: {}]   ;;  %s1761_s4 = inlined_call_operand.vmem [shape: f32[1,64], index: 4, kind: input, shape index: {}]   ;;  %s1762_s5 = inlined_call_operand.vmem [shape: bf16[192,64], index: 5, kind: input, shape index: {}]   ;;  %s1763_s6 = inlined_call_operand.vmem [shape: f32[1,64], index: 6, kind: input, shape index: {}]   ;;  %s1764_s7 = inlined_call_operand.hbm [shape: bf16[2,40,64], index: 7, kind: output, shape index: {}]  }
   0x1   :  { %14 = vsyncpa [#allocation3 + $0x1], 0  ;;  %s1409_s24 = smov 0   ;;  %s1411_s25 = smov 0  }
   0x2   :  { %s1413_s26 = smov 0   ;;  %s1415_s27 = smov 0  }
   0x3 LB: > { %s1430_s28 = sadd.s32 4294967295, %s1360_s27   ;;  %s1123_s29 = sadd.s32 4294967294, %s1360_s27   ;;  %s1360_s27 = sphi %s1415_s27, %s1770_s27   ;;  %s1356_s26 = sphi %s1413_s26, %s1769_s26   ;;  %s1352_s25 = sphi %s1411_s25, %s1768_s25   ;;  %s1348_s24 = sphi %s1409_s24, %s1767_s24  }
   0x4   : > { %s1434_s30 = sadd.s32 1, %s1360_s27   ;;  %s179_s8 = sadd.s32 1, %s1356_s26 }
   0x5   : > { %s176_s9 = ssub.s32 %s1360_s27, %s1434_s30  ;;  %p189_p0 = scmp.ne.s32.totalorder %s1356_s26, %s1352_s25 }
   0x6   : > { %p177_p1 = scmp.eq.s32.totalorder %s176_s9, 0  ;;  %p190_p2 = scmp.eq.s32.totalorder %s1430_s28, 1 }
   0x7   : > { %p195_p3 = scmp.ne.s32.totalorder %s1352_s25, %s1348_s24  ;;  %p196_p4 = scmp.eq.s32.totalorder %s1123_s29, 1 }
   0x8   : > { %s1445_s10 = scalar_select %p177_p1, %s1356_s26, %s179_s8  }
   0x9   : > { %p1447_p5 = por %p190_p2, %p189_p0  ;;  %p1451_p6 = por %p196_p4, %p195_p3 }
   0xa   : > { %p1126_p7 = scmp.ge.s32.totalorder %s1360_s27, 1  ;;  %p240_p8 = scmp.lt.s32.totalorder %s1360_s27, 3 }
   0xc   : > { %p241_p9 = pnand %p1126_p7, %p240_p8 }
   0xd   : > { %p272_p10 = scmp.lt.s32.totalorder (!%p241_p9), %s1430_s28, 1  ;;  %v1269_v0 = vld [vmem:[%s1758_s1] sm:$0xff] (!%p241_p9)   ;;  %v1270_v1 = vld [vmem:[%s1758_s1 + $0x8] sm:$0xff] (!%p241_p9)   ;;  %vm392_vm0 = vcmask (!%p241_p9), 1045504   ;;  %v1271_v2 = vld [vmem:[%s1758_s1 + $0x10] sm:$0xff] (!%p241_p9)   ;;  %vm344_vm2 = vcmask (!%p241_p9), 1046528  }
   0xe   : > { %244 = sbr.rel (%p241_p9) target bundleno = 1107 (0x453), region = 48  ;;  %1199 = vmatprep.subr.bf16.mxu0 (!%p241_p9), %v1269_v0  ;;  %vm304_vm1 = vsmask.f32 (!%p241_p9), 7424  ;;  %v1272_v19 = vld [vmem:[%s1758_s1 + $0x18] sm:$0xff] (!%p241_p9)   ;;  %s1362_s9 = smov (!%p241_p9), 64   ;;  %v1273_v24 = vld [vmem:[%s1758_s1 + $0x20] sm:$0xff] (!%p241_p9)  }
   0xf   : > { %1200 = vmatpush3.bf16.msra.mxu0 (!%p241_p9), %v1269_v0  ;;  %vm363_vm3 = vsmask.f32 (!%p241_p9), 6400  ;;  %s1364_s16 = smov (!%p241_p9), 16   ;;  %s1365_s17 = smov (!%p241_p9), 48   ;;  %vm408_vm4 = vcmask (!%p241_p9), 130048   ;;  %vm417_vm5 = vcmask (!%p241_p9), 261120  }
  0x10   : > { %1201 = vmatprep.subr.bf16.mxu0 (!%p241_p9), %v1270_v1  ;;  %vm426_vm6 = vcmask (!%p241_p9), 392192   ;;  %vm435_vm7 = vcmask (!%p241_p9), 523264   ;;  %vm491_vm8 = vcmask (!%p241_p9), 654336   ;;  %vm620_vm9 = vcmask (!%p241_p9), 1044480   ;;  %s1218_s29 = smul.u32 (!%p241_p9), 320, %s1430_s28 }
  0x11   : > { %vm829_vm10 = vcmask (!%p241_p9), 1043456   ;;  %vm1041_vm11 = vcmask (!%p241_p9), 519168  }
  0x12   : > { %s1709_s14 = scalar_lea.hbm (!%p241_p9), %s1764_s7, %s1218_s29 }
  0x13   : > { %1202 = vmatpush3.bf16.msra.mxu0 (!%p241_p9), %v1270_v1 }
  0x14   : > { %1203 = vmatprep.subr.bf16.mxu0 (!%p241_p9), %v1271_v2 }
  0x15   : > { %s273_s13 = scalar_select %p272_p10, %s1430_s28, 1 }
  0x17   : > { %s1184_s18 = sshll.u32 %s273_s13, 5  ;;  %s1363_s13 = smov 32   ;;  %1204 = vmatpush3.bf16.msra.mxu0 %v1271_v2 }
  0x18   : > { %s1468_s21 = scalar_lea.vmem %s1757_s0, %s1184_s18  ;;  %1205 = vmatprep.subr.bf16.mxu0 %v1272_v19  ;;  %s269_s18 = sand.u32 1, %s1352_s25  }
  0x19   : > { %v1474_v3 = vld [vmem:[%s1468_s21] sm:$0xff]   ;;  %v1477_v4 = vld [vmem:[%s1468_s21 + $0x8] sm:$0xff]   ;;  %v1480_v5 = vld [vmem:[%s1468_s21 + $0x10] sm:$0xff]   ;;  %s1714_s15 = scalar_lea.sflag [#allocation3], %s269_s18 }
  0x1a   : > { %v393_v6 = vrot.slane %v1474_v3, 2  ;;  %v394_v7 = vrot.slane %v1477_v4, 2  ;;  %v345_v8 = vrot.slane %v1474_v3, 1  ;;  %v346_v9 = vrot.slane %v1477_v4, 1  ;;  %v284_v14 = vld [vmem:[%s1468_s21 + $0x18] sm:$0xf] }
  0x1b   : > { %v348_v10 = vrot.slane %v1480_v5, 1  ;;  %v306_v11 = vshrl.u32 %v1474_v3, 16  ;;  %v308_v12 = vshll.u32 %v1474_v3, 16  ;;  %v313_v13 = vshll.u32 %v1477_v4, 16  ;;  %v285_v23 = vld [vmem:[%s1468_s21 + $0x1c] sm:$0x1]  ;;  %1206 = vmatpush3.bf16.msra.mxu0 %v1272_v19 }
  0x1c   : > { %v395_v15 = vsel %vm392_vm0, %v393_v6, %v394_v7  ;;  %v347_v16 = vsel %vm344_vm2, %v345_v8, %v346_v9  ;;  %v396_v17 = vrot.slane %v1480_v5, 2  ;;  %v317_v18 = vshrl.u32 %v1477_v4, 16  ;;  %1207 = vmatprep.subr.bf16.mxu0 %v1273_v24  ;;  %s1217_s21 = smul.u32 20, %s269_s18 }
  0x1d   : > { %400 = vrot.lane.b32.xlu0 %v395_v15, %s1362_s9  ;;  %352 = vrot.lane.b32.xlu1 %v347_v16, %s1363_s13  ;;  %v310_v20 = vrot.slane %v308_v12, 1  ;;  %v315_v21 = vrot.slane %v313_v13, 1  ;;  %v321_v22 = vshll.u32 %v1480_v5, 16  ;;  %v349_v25 = vsel %vm344_vm2, %v346_v9, %v348_v10 }
  0x1e   : > { %v1508_v26 = vcombine.low %v284_v14, %v284_v14  ;;  %v364_v27 = vrot.slane %v306_v11, 1  ;;  %v365_v28 = vrot.slane %v308_v12, 2  ;;  %v367_v32 = vrot.slane %v317_v18, 1  ;;  %s271_s22 = scalar_lea.vmem [#allocation2], %s1217_s21 }
  0x1f   : > { %v311_v29 = vor.u32 %v310_v20, %v306_v11  ;;  %v319_v30 = vor.u32 %v317_v18, %v315_v21  ;;  %v323_v31 = vrot.slane %v321_v22, 1  ;;  %v368_v34 = vrot.slane %v313_v13, 2  ;;  %1208 = vmatpush3.bf16.msra.mxu0 %v1273_v24  ;;  %s1061_s23 = sshll.u32 %s271_s22, 4  ;;  %s1704_s23 = int_to_ptr.vmem [resolvable:$true] %s1061_s23 }
  0x20   : > { %v329_v33 = vshll.u32 %v1508_v26, 16  ;;  %v333_v36 = vshrl.u32 %v1508_v26, 16  ;;  %v325_v37 = vshrl.u32 %v1480_v5, 16  ;;  %v397_v38 = vsel %vm392_vm0, %v394_v7, %v396_v17  ;;  %s1298_s28 = scalar_lea.vmem %s1704_s23, 320 }
  0x21   : > { %354 = vrot.lane.b32.xlu1 %v349_v25, %s1363_s13  ;;  %v316_v35 = vsel %vm304_vm1, %v311_v29, %v315_v21  ;;  %v372_v40 = vrot.slane %v321_v22, 2  ;;  %v1133_v41 = vcombine.low %v284_v14, %v285_v23  ;;  %v324_v42 = vsel %vm304_vm1, %v319_v30, %v323_v31  ;;  %p1299_p11 = scmp.ne.s32.totalorder %s1704_s23, %s1298_s28 }
  0x22   : > { %336 = vrot.lane.b32.xlu0 %v316_v35, %s1364_s16  ;;  %v331_v39 = vrot.slane %v329_v33, 1  ;;  %v366_v43 = vor.u32 %v365_v28, %v364_v27  ;;  %v369_v44 = vor.u32 %v368_v34, %v367_v32  ;;  %v371_v45 = vrot.slane %v325_v37, 1  ;;  %v1275_v32 = vld [vmem:[%s1760_s3 + $0x8] sm:$0xff]   ;;  %v1276_v33 = vld [vmem:[%s1760_s3 + $0x10] sm:$0xff]   ;;  %v1277_v34 = vld [vmem:[%s1760_s3 + $0x18] sm:$0xff]  }
  0x23   : > { %v376_v46 = vshrl.u32 %v1133_v41, 16  ;;  %v379_v48 = vshll.u32 %v1133_v41, 16  ;;  %v350_v50 = vrot.slane %v1508_v26, 1  ;;  %v327_v52 = vor.u32 %v325_v37, %v323_v31  ;;  %v1278_v35 = vld [vmem:[%s1760_s3 + $0x20] sm:$0xff]   ;;  %v1280_v37 = vld [vmem:[%s1760_s3 + $0x30] sm:$0xff]   ;;  %p1300_p12 = pnand %p1299_p11, %p1447_p5 }
  0x24   : > { %v335_v47 = vor.u32 %v333_v36, %v331_v39  ;;  %v373_v49 = vor.u32 %v372_v40, %v371_v45  ;;  %v370_v51 = vsel %vm363_vm3, %v366_v43, %v369_v44  ;;  %v398_v60 = vrot.slane %v1133_v41, 2  ;;  %v1279_v36 = vld [vmem:[%s1760_s3 + $0x28] sm:$0xff]   ;;  %v1284_v41 = vld [vmem:[%s1760_s3 + $0x50] sm:$0xff]   ;;  %v1134_v43 = vld [vmem:[%s1759_s2] ss:$0 sm:$0xff] }
  0x25   : > { %402 = vrot.lane.b32.xlu1 %v397_v38, %s1362_s9  ;;  %v378_v53 = vrot.slane %v376_v46, 1  ;;  %v381_v54 = vrot.slane %v379_v48, 2  ;;  %v332_v56 = vsel %vm304_vm1, %v327_v52, %v331_v39  ;;  %v351_v57 = vsel %vm344_vm2, %v348_v10, %v350_v50  ;;  %v1281_v38 = vld [vmem:[%s1760_s3 + $0x38] sm:$0xff]   ;;  %v1282_v39 = vld [vmem:[%s1760_s3 + $0x40] sm:$0xff]   ;;  %v1283_v40 = vld [vmem:[%s1760_s3 + $0x48] sm:$0xff]   ;;  %p1301_p13 = pneg %p1300_p12 }
  0x26   : > { %338 = vrot.lane.b32.xlu0 %v324_v42, %s1364_s16  ;;  %v374_v55 = vsel %vm363_vm3, %v369_v44, %v373_v49  ;;  %v399_v61 = vsel %vm392_vm0, %v396_v17, %v398_v60  ;;  %v1285_v42 = vld [vmem:[%s1760_s3 + $0x58] sm:$0xff]  }
  0x27   : > { %v382_v58 = vor.u32 %v381_v54, %v378_v53 }
  0x29   : > { %342 = vrot.lane.b32.xlu1 %v335_v47, %s1364_s16  ;;  %v383_v59 = vsel %vm363_vm3, %v373_v49, %v382_v58 }
  0x2a   : > { %384 = vrot.lane.b32.xlu0 %v370_v51, %s1365_s17 }
  0x2d   : > { %386 = vrot.lane.b32.xlu1 %v374_v55, %s1365_s17 }
  0x2e   : > { %340 = vrot.lane.b32.xlu0 %v332_v56, %s1364_s16  ;;  %s1367_s16 = smov [#allocation2]  }
  0x31   : > { %358 = vrot.lane.b32.xlu1 %v350_v50, %s1363_s13 }
  0x32   : > { %356 = vrot.lane.b32.xlu0 %v351_v57, %s1363_s13 }
  0x35   : > { %390 = vrot.lane.b32.xlu1 %v382_v58, %s1365_s17 }
  0x36   : > { %388 = vrot.lane.b32.xlu0 %v383_v59, %s1365_s17  ;;  %s1302_s17 = sshll.u32 %s1367_s16, 4  ;;  %s1303_s17 = int_to_ptr.vmem [resolvable:$false] %s1302_s17 }
  0x37   : > { %s1304_s19 = scalar_lea.vmem %s1303_s17, 640  ;;  %p1305_p0 = scmp.lt.s32.totalorder %s1704_s23, %s1303_s17 }
  0x38   : > { %p1306_p1 = scmp.lt.s32.totalorder %s1304_s19, %s1298_s28 }
  0x39   : > { %406 = vrot.lane.b32.xlu1 %v398_v60, %s1362_s9 }
  0x3a   : > { %404 = vrot.lane.b32.xlu0 %v399_v61, %s1362_s9  ;;  %p1307_p2 = por %p1306_p1, %p1305_p0 }
  0x3c   : > { %p1308_p3 = pnand %p1307_p2, %p1301_p13 }
  0x8f   : > { %v401_v62 = vpop.permute.xlu0 %400  ;;  %v353_v63 = vpop.permute.xlu1 %352 }
  0x93   : > { %v355_v0 = vpop.permute.xlu1 %354 }
  0x94   : > { %v337_v1 = vpop.permute.xlu0 %336 }
  0x95   : > { %v410_v7 = vsel %vm408_vm4, %v1474_v3, %v337_v1 }
  0x96   : > { %v419_v10 = vsel %vm417_vm5, %v410_v7, %v353_v63 }
  0x97   : > { %v403_v2 = vpop.permute.xlu1 %402 }
  0x98   : > { %v339_v6 = vpop.permute.xlu0 %338 }
  0x99   : > { %v412_v9 = vsel %vm408_vm4, %v1477_v4, %v339_v6 }
  0x9a   : > { %v421_v3 = vsel %vm417_vm5, %v412_v9, %v355_v0 }
  0x9b   : > { %v343_v8 = vpop.permute.xlu1 %342 }
  0x9c   : > { %v385_v11 = vpop.permute.xlu0 %384  ;;  %v416_v21 = vsel %vm408_vm4, %v1508_v26, %v343_v8  ;;  %v1366_v26 = vmov 0  }
  0x9d   : > { %v428_v12 = vsel %vm426_vm6, %v419_v10, %v385_v11  ;;  %749 = vmatprep.subr.bf16.mxu1 %v1366_v26  ;;  %959 = vmatprep.subr.bf16.mxu0 %v1366_v26 }
  0x9e   : > { %v437_v13 = vsel %vm435_vm7, %v428_v12, %v401_v62 }
  0x9f   : > { %1209 = vmatprep.mubr.msk.bf16.mxu0 %vm491_vm8, %v437_v13  ;;  %v387_v14 = vpop.permute.xlu1 %386 }
  0xa0   : > { %v430_v15 = vsel %vm426_vm6, %v421_v3, %v387_v14  ;;  %v341_v16 = vpop.permute.xlu0 %340 }
  0xa1   : > { %v439_v17 = vsel %vm435_vm7, %v430_v15, %v403_v2  ;;  %v414_v22 = vsel %vm408_vm4, %v1480_v5, %v341_v16  ;;  %v1274_v5 = vld [vmem:[%s1760_s3] sm:$0xff]  }
  0xa2   : > { %1210 = vmatmul.mubr.msk.bf16.vlgmr.msra.gmra.mrb[0].mxu0 %vm491_vm8, %v439_v17  ;;  %750 = vmatpush1.bf16.msra.mxu1 %v1274_v5 }
  0xa3   : > { %v359_v4 = vpop.permute.xlu1 %358  ;;  %751 = vmatprep.subr.bf16.mxu1 %v1366_v26 }
  0xa4   : > { %v357_v18 = vpop.permute.xlu0 %356  ;;  %v425_v23 = vsel %vm417_vm5, %v416_v21, %v359_v4 }
  0xa5   : > { %v423_v24 = vsel %vm417_vm5, %v414_v22, %v357_v18 }
  0xa6   : > { %752 = vmatpush1.bf16.msra.mxu1 %v1275_v32 }
  0xa7   : > { %v391_v19 = vpop.permute.xlu1 %390  ;;  %753 = vmatprep.subr.bf16.mxu1 %v1366_v26 }
  0xa8   : > { %v389_v20 = vpop.permute.xlu0 %388  ;;  %v434_v25 = vsel %vm426_vm6, %v425_v23, %v391_v19 }
  0xa9   : > { %v432_v28 = vsel %vm426_vm6, %v423_v24, %v389_v20 }
  0xaa   : > { %754 = vmatpush1.bf16.msra.mxu1 %v1276_v33 }
  0xab   : > { %v407_v27 = vpop.permute.xlu1 %406  ;;  %755 = vmatprep.subr.bf16.mxu1 %v1366_v26 }
  0xac   : > { %v443_v29 = vsel %vm435_vm7, %v434_v25, %v407_v27  ;;  %v405_v30 = vpop.permute.xlu0 %404 }
  0xad   : > { %v441_v31 = vsel %vm435_vm7, %v432_v28, %v405_v30 }
  0xae   : > { %1213 = vmatprep.mubr.msk.bf16.mxu0 %vm491_vm8, %v441_v31  ;;  %756 = vmatpush1.bf16.msra.mxu1 %v1277_v34 }
  0xaf   : > { %1214 = vmatmul.mubr.msk.bf16.gmra.mrb[4].mxu0 %vm491_vm8, %v443_v29  ;;  %757 = vmatprep.subr.bf16.mxu1 %v1366_v26 }
  0xb2   : > { %758 = vmatpush1.bf16.msra.mxu1 %v1278_v35 }
  0xb3   : > { %759 = vmatprep.subr.bf16.mxu1 %v1366_v26 }
  0xb6   : > { %760 = vmatpush1.bf16.msra.mxu1 %v1279_v36 }
  0xb7   : > { %761 = vmatprep.subr.bf16.mxu1 %v1366_v26 }
  0xba   : > { %762 = vmatpush1.bf16.msra.mxu1 %v1280_v37 }
  0xbb   : > { %763 = vmatprep.subr.bf16.mxu1 %v1366_v26 }
  0xbe   : > { %764 = vmatpush1.bf16.msra.mxu1 %v1281_v38 }
  0xbf   : > { %765 = vmatprep.subr.bf16.mxu1 %v1366_v26 }
  0xc2   : > { %766 = vmatpush1.bf16.msra.mxu1 %v1282_v39 }
  0xc3   : > { %767 = vmatprep.subr.bf16.mxu1 %v1366_v26 }
  0xc6   : > { %768 = vmatpush1.bf16.msra.mxu1 %v1283_v40 }
  0xc7   : > { %769 = vmatprep.subr.bf16.mxu1 %v1366_v26 }
  0xca   : > { %770 = vmatpush1.bf16.msra.mxu1 %v1284_v41 }
  0xcb   : > { %771 = vmatprep.subr.bf16.mxu1 %v1366_v26 }
  0xce   : > { %772 = vmatpush1.bf16.msra.mxu1 %v1285_v42 }
 0x175   : > { %v1211_v44 = vpop.f32.mrb[0].mxu0 }
 0x176   : > { %v543_v45 = vadd.f32 %v1211_v44, %v1134_v43  ;;  %v534_v46 = vpop.f32.mrb[1].mxu0  ;;  %v1287_v44 = vld [vmem:[%s1762_s5 + $0x8] sm:$0xff]  }
 0x177   : > { %v535_v47 = vadd.f32 %v1134_v43, %v534_v46  ;;  %v1212_v48 = vpop.f32.mrb[2].mxu0  ;;  %v1289_v46 = vld [vmem:[%s1762_s5 + $0x18] sm:$0xff]  }
 0x178   : > { %v546_v49 = vadd.f32 %v1212_v48, %v1134_v43  ;;  %v537_v50 = vpop.f32.mrb[3].mxu0  ;;  %v566_v52 = vmax.f32 %v543_v45, 0.0  ;;  %v1288_v45 = vld [vmem:[%s1762_s5 + $0x10] sm:$0xff]   ;;  %v1291_v48 = vld [vmem:[%s1762_s5 + $0x28] sm:$0xff]  }
 0x179   : > { %v538_v51 = vadd.f32 %v1134_v43, %v537_v50  ;;  %v564_v54 = vmax.f32 %v535_v47, 0.0  ;;  %v1290_v47 = vld [vmem:[%s1762_s5 + $0x20] sm:$0xff]   ;;  %v1293_v50 = vld [vmem:[%s1762_s5 + $0x38] sm:$0xff]  }
 0x17a   : > { %v567_v53 = vmax.f32 %v546_v49, 0.0  ;;  %v1292_v49 = vld [vmem:[%s1762_s5 + $0x30] sm:$0xff]  }
 0x17b   : > { %v565_v55 = vmax.f32 %v538_v51, 0.0  ;;  %v1294_v51 = vld [vmem:[%s1762_s5 + $0x40] sm:$0xff]  }
 0x17c   : > { %v572_v56 = vpack.c.bf16 %v567_v53, %v566_v52  ;;  %v1295_v52 = vld [vmem:[%s1762_s5 + $0x48] sm:$0xff]   ;;  %v1296_v53 = vld [vmem:[%s1762_s5 + $0x50] sm:$0xff]  }
 0x17d   : > { %v571_v57 = vpack.c.bf16 %v565_v55, %v564_v54  ;;  %v1297_v54 = vld [vmem:[%s1762_s5 + $0x58] sm:$0xff]   ;;  %v1144_v55 = vld [vmem:[%s1761_s4] ss:$0 sm:$0xff] }
 0x17e   : > { %v622_v58 = vrot.slane %v572_v56, 3  ;;  %v584_v59 = vshrl.u32 %v572_v56, 16  ;;  %v587_v60 = vshll.u32 %v572_v56, 16 }
 0x17f   : > { %v621_v61 = vrot.slane %v571_v57, 3  ;;  %v576_v62 = vshrl.u32 %v571_v57, 16  ;;  %v579_v63 = vshll.u32 %v571_v57, 16 }
 0x180   : > { %v586_v0 = vrot.slane %v584_v59, 1  ;;  %v589_v1 = vrot.slane %v587_v60, 2 }
 0x181   : > { %v623_v2 = vsel %vm620_vm9, %v621_v61, %v622_v58  ;;  %v578_v6 = vrot.slane %v576_v62, 1  ;;  %v581_v7 = vrot.slane %v579_v63, 2 }
 0x182   : > { %v1215_v8 = vpop.f32.mrb[4].mxu0  ;;  %1157 = vmatprep.mubr.msk.bf16.mxu1 %vm435_vm7, %v623_v2  ;;  %v590_v9 = vor.u32 %v589_v1, %v586_v0 }
 0x183   : > { %v559_v10 = vadd.f32 %v1215_v8, %v1134_v43  ;;  %v550_v11 = vpop.f32.mrb[5].mxu0  ;;  %v582_v12 = vor.u32 %v581_v7, %v578_v6 }
 0x184   : > { %v551_v13 = vadd.f32 %v1134_v43, %v550_v11  ;;  %v1216_v14 = vpop.f32.mrb[6].mxu0 }
 0x185   : > { %v570_v3 = vmax.f32 %v559_v10, 0.0  ;;  %v553_v15 = vpop.f32.mrb[7].mxu0  ;;  %v591_v16 = vsel %vm363_vm3, %v582_v12, %v590_v9 }
 0x186   : > { %v554_v17 = vadd.f32 %v1134_v43, %v553_v15  ;;  %610 = vrot.lane.b32.xlu0 %v591_v16, %s1362_s9  ;;  %v568_v18 = vmax.f32 %v551_v13, 0.0  ;;  %v1286_v43 = vld [vmem:[%s1762_s5] sm:$0xff]  }
 0x187   : > { %v574_v4 = vpack.c.bf16 %v570_v3, %v570_v3  ;;  %960 = vmatpush1.bf16.msra.mxu0 %v1286_v43 }
 0x188   : > { %v569_v19 = vmax.f32 %v554_v17, 0.0  ;;  %961 = vmatprep.subr.bf16.mxu0 %v1366_v26 }
 0x189   : > { %v602_v20 = vshrl.u32 %v574_v4, 16  ;;  %v605_v21 = vshll.u32 %v574_v4, 16  ;;  %v626_v24 = vrot.slane %v574_v4, 3 }
 0x18a   : > { %v573_v22 = vpack.c.bf16 %v569_v19, %v568_v18 }
 0x18b   : > { %v604_v23 = vrot.slane %v602_v20, 1  ;;  %v607_v25 = vrot.slane %v605_v21, 2  ;;  %962 = vmatpush1.bf16.msra.mxu0 %v1287_v44 }
 0x18c   : > { %v593_v27 = vshrl.u32 %v573_v22, 16  ;;  %v596_v28 = vshll.u32 %v573_v22, 16  ;;  %v624_v29 = vrot.slane %v573_v22, 3  ;;  %963 = vmatprep.subr.bf16.mxu0 %v1366_v26 }
 0x18d   : > { %v608_v34 = vor.u32 %v607_v25, %v604_v23 }
 0x18e   : > { %v595_v30 = vrot.slane %v593_v27, 1  ;;  %v598_v31 = vrot.slane %v596_v28, 2  ;;  %v625_v5 = vsel %vm620_vm9, %v622_v58, %v624_v29  ;;  %v627_v32 = vsel %vm620_vm9, %v624_v29, %v626_v24 }
 0x18f   : > { %964 = vmatpush1.bf16.msra.mxu0 %v1288_v45 }
 0x190   : > { %v599_v33 = vor.u32 %v598_v31, %v595_v30  ;;  %965 = vmatprep.subr.bf16.mxu0 %v1366_v26 }
 0x192   : > { %v609_v35 = vsel %vm363_vm3, %v599_v33, %v608_v34  ;;  %v600_v36 = vsel %vm363_vm3, %v590_v9, %v599_v33 }
 0x193   : > { %614 = vrot.lane.b32.xlu0 %v609_v35, %s1362_s9  ;;  %612 = vrot.lane.b32.xlu1 %v600_v36, %s1362_s9  ;;  %v1160_v35 = vld [vmem:[%s1763_s6] ss:$0 sm:$0xff] }
 0x194   : > { %966 = vmatpush1.bf16.msra.mxu0 %v1289_v46 }
 0x195   : > { %967 = vmatprep.subr.bf16.mxu0 %v1366_v26 }
 0x198   : > { %968 = vmatpush1.bf16.msra.mxu0 %v1290_v47 }
 0x199   : > { %969 = vmatprep.subr.bf16.mxu0 %v1366_v26 }
 0x19c   : > { %970 = vmatpush1.bf16.msra.mxu0 %v1291_v48 }
 0x19d   : > { %971 = vmatprep.subr.bf16.mxu0 %v1366_v26 }
 0x1a0   : > { %972 = vmatpush1.bf16.msra.mxu0 %v1292_v49 }
 0x1a1   : > { %973 = vmatprep.subr.bf16.mxu0 %v1366_v26 }
 0x1a4   : > { %974 = vmatpush1.bf16.msra.mxu0 %v1293_v50 }
 0x1a5   : > { %975 = vmatprep.subr.bf16.mxu0 %v1366_v26 }
 0x1a8   : > { %976 = vmatpush1.bf16.msra.mxu0 %v1294_v51 }
 0x1a9   : > { %977 = vmatprep.subr.bf16.mxu0 %v1366_v26 }
 0x1ac   : > { %978 = vmatpush1.bf16.msra.mxu0 %v1295_v52 }
 0x1ad   : > { %979 = vmatprep.subr.bf16.mxu0 %v1366_v26 }
 0x1b0   : > { %980 = vmatpush1.bf16.msra.mxu0 %v1296_v53 }
 0x1b1   : > { %981 = vmatprep.subr.bf16.mxu0 %v1366_v26 }
 0x1b4   : > { %982 = vmatpush1.bf16.msra.mxu0 %v1297_v54 }
 0x1f8   : > { %v611_v37 = vpop.permute.xlu0 %610 }
 0x1f9   : > { %v629_v38 = vsel %vm435_vm7, %v571_v57, %v611_v37 }
 0x1fa   : > { %782 = vmatmul.mubr.bf16.vlgmr.msra.gmra.mrb[0].mxu1 %v629_v38 }
 0x1fb   : > { %1158 = vmatprep.mubr.msk.bf16.mxu1 %vm435_vm7, %v625_v5 }
 0x205   : > { %v613_v39 = vpop.permute.xlu1 %612  ;;  %v615_v41 = vpop.permute.xlu0 %614 }
 0x206   : > { %v632_v40 = vsel %vm435_vm7, %v572_v56, %v613_v39  ;;  %v635_v42 = vsel %vm435_vm7, %v573_v22, %v615_v41 }
 0x207   : > { %790 = vmatmul.mubr.bf16.gmra.mrb[4].mxu1 %v632_v40 }
 0x208   : > { %1159 = vmatprep.mubr.msk.bf16.mxu1 %vm435_vm7, %v627_v32 }
 0x20f   : > { %798 = vmatmul.mubr.bf16.gmra.mrb[8].mxu1 %v635_v42 }
 0x2cd   : > { %v783_v56 = vpop.f32.mrb[0].mxu1 }
 0x2ce   : > { %v784_v57 = vadd.f32 %v1144_v55, %v783_v56  ;;  %v785_v58 = vpop.f32.mrb[1].mxu1 }
 0x2cf   : > { %v786_v59 = vpop.f32.mrb[2].mxu1 }
 0x2d0   : > { %v787_v60 = vadd.f32 %v1144_v55, %v786_v59  ;;  %v788_v61 = vpop.f32.mrb[3].mxu1  ;;  %v806_v62 = vmax.f32 %v784_v57, 0.0 }
 0x2d2   : > { %v807_v63 = vmax.f32 %v787_v60, 0.0 }
 0x2d4   : > { %v812_v0 = vpack.c.bf16 %v807_v63, %v806_v62 }
 0x2d6   : > { %v830_v12 = vrot.slane %v812_v0, 4  ;;  %v818_v16 = vrot.slane %v812_v0, 2 }
 0x2da   : > { %v791_v1 = vpop.f32.mrb[4].mxu1 }
 0x2db   : > { %v792_v2 = vadd.f32 %v1144_v55, %v791_v1  ;;  %v793_v6 = vpop.f32.mrb[5].mxu1 }
 0x2dc   : > { %v794_v7 = vpop.f32.mrb[6].mxu1 }
 0x2dd   : > { %v795_v8 = vadd.f32 %v1144_v55, %v794_v7  ;;  %v796_v26 = vpop.f32.mrb[7].mxu1  ;;  %v808_v9 = vmax.f32 %v792_v2, 0.0 }
 0x2df   : > { %v809_v10 = vmax.f32 %v795_v8, 0.0 }
 0x2e1   : > { %v813_v11 = vpack.c.bf16 %v809_v10, %v808_v9 }
 0x2e2   : > { %v799_v13 = vpop.f32.mrb[8].mxu1 }
 0x2e3   : > { %v831_v14 = vrot.slane %v813_v11, 4  ;;  %v800_v3 = vadd.f32 %v1144_v55, %v799_v13  ;;  %v801_v15 = vpop.f32.mrb[9].mxu1  ;;  %v819_v17 = vrot.slane %v813_v11, 2 }
 0x2e4   : > { %v802_v4 = vpop.f32.mrb[10].mxu1 }
 0x2e5   : > { %v803_v18 = vadd.f32 %v1144_v55, %v802_v4  ;;  %v804_v19 = vpop.f32.mrb[11].mxu1  ;;  %v832_v20 = vsel %vm829_vm10, %v830_v12, %v831_v14  ;;  %v820_v21 = vsel %vm392_vm0, %v818_v16, %v819_v17  ;;  %v810_v22 = vmax.f32 %v800_v3, 0.0 }
 0x2e6   : > { %1173 = vmatprep.mubr.msk.bf16.mxu0 %vm435_vm7, %v832_v20  ;;  %823 = vrot.lane.b32.xlu1 %v820_v21, %s1362_s9 }
 0x2e7   : > { %v811_v23 = vmax.f32 %v803_v18, 0.0 }
 0x2e9   : > { %v814_v24 = vpack.c.bf16 %v811_v23, %v810_v22 }
 0x2eb   : > { %v833_v25 = vrot.slane %v814_v24, 4  ;;  %v821_v27 = vrot.slane %v814_v24, 2 }
 0x2ed   : > { %827 = vrot.lane.b32.xlu1 %v821_v27, %s1362_s9  ;;  %v822_v28 = vsel %vm392_vm0, %v819_v17, %v821_v27  ;;  %v834_v29 = vsel %vm829_vm10, %v831_v14, %v833_v25 }
 0x2ee   : > { %825 = vrot.lane.b32.xlu0 %v822_v28, %s1362_s9 }
 0x358   : > { %v824_v30 = vpop.permute.xlu1 %823 }
 0x359   : > { %v837_v31 = vsel %vm435_vm7, %v812_v0, %v824_v30 }
 0x35a   : > { %992 = vmatmul.mubr.bf16.vlgmr.msra.gmra.mrb[8].mxu0 %v837_v31 }
 0x35b   : > { %1174 = vmatprep.mubr.msk.bf16.mxu0 %vm435_vm7, %v834_v29 }
 0x35f   : > { %v828_v33 = vpop.permute.xlu1 %827 }
 0x360   : > { %v826_v5 = vpop.permute.xlu0 %825  ;;  %v845_v34 = vsel %vm435_vm7, %v814_v24, %v828_v33 }
 0x361   : > { %v841_v32 = vsel %vm435_vm7, %v813_v11, %v826_v5 }
 0x362   : > { %1000 = vmatmul.mubr.bf16.gmra.mrb[12].mxu0 %v841_v32 }
 0x363   : > { %1175 = vmatprep.mubr.msk.bf16.mxu0 %vm435_vm7, %v833_v25 }
 0x36a   : > { %1008 = vmatmul.mubr.bf16.gmra.mrb[16].mxu0 %v845_v34 }
 0x42d   : > { %v993_v36 = vpop.f32.mrb[8].mxu0 }
 0x42e   : > { %v994_v37 = vadd.f32 %v1160_v35, %v993_v36  ;;  %v995_v38 = vpop.f32.mrb[9].mxu0 }
 0x42f   : > { %v996_v39 = vpop.f32.mrb[10].mxu0 }
 0x430   : > { %v1015_v40 = vmax.f32 %v994_v37, 0.0  ;;  %v997_v41 = vadd.f32 %v1160_v35, %v996_v39  ;;  %v998_v42 = vpop.f32.mrb[11].mxu0 }
 0x432   : > { %v1185_v43 = vpack.c.bf16 %v1015_v40, %v1015_v40  ;;  %v1016_v44 = vmax.f32 %v997_v41, 0.0 }
 0x434   : > { %1042 = vst.msk [vmem:[%s271_s22] sm:$0xf] %vm1041_vm11, %v1185_v43  ;;  %v1186_v45 = vpack.c.bf16 %v1016_v44, %v1016_v44 }
 0x435   : > { %v1001_v46 = vpop.f32.mrb[12].mxu0 }
 0x436   : > { %1043 = vst.msk [vmem:[%s271_s22 + $0x4] sm:$0xf] %vm1041_vm11, %v1186_v45  ;;  %v1002_v47 = vadd.f32 %v1160_v35, %v1001_v46  ;;  %v1003_v48 = vpop.f32.mrb[13].mxu0 }
 0x437   : > { %v1004_v49 = vpop.f32.mrb[14].mxu0 }
 0x438   : > { %v1017_v50 = vmax.f32 %v1002_v47, 0.0  ;;  %v1005_v51 = vadd.f32 %v1160_v35, %v1004_v49  ;;  %v1006_v52 = vpop.f32.mrb[15].mxu0 }
 0x43a   : > { %v1187_v53 = vpack.c.bf16 %v1017_v50, %v1017_v50  ;;  %v1018_v54 = vmax.f32 %v1005_v51, 0.0 }
 0x43c   : > { %1044 = vst.msk [vmem:[%s271_s22 + $0x8] sm:$0xf] %vm1041_vm11, %v1187_v53  ;;  %v1188_v55 = vpack.c.bf16 %v1018_v54, %v1018_v54 }
 0x43d   : > { %v1009_v56 = vpop.f32.mrb[16].mxu0 }
 0x43e   : > { %1045 = vst.msk [vmem:[%s271_s22 + $0xc] sm:$0xf] %vm1041_vm11, %v1188_v55  ;;  %v1010_v57 = vadd.f32 %v1160_v35, %v1009_v56  ;;  %v1011_v58 = vpop.f32.mrb[17].mxu0 }
 0x43f   : > { %v1012_v59 = vpop.f32.mrb[18].mxu0 }
 0x440   : > { %v1019_v60 = vmax.f32 %v1010_v57, 0.0  ;;  %v1013_v61 = vpop.f32.mrb[19].mxu0 }
 0x442   : > { %v1189_v62 = vpack.c.bf16 %v1019_v60, %v1019_v60 }
 0x444   : > { %1046 = vst.msk [vmem:[%s271_s22 + $0x10] sm:$0xf] %vm1041_vm11, %v1189_v62 }
 0x445   : > { %1311 = shalt.err (!%p1308_p3)
}
 0x446   : > { %s1312_s18 = scalar_lea.hbm %s1709_s14, 320  ;;  %s1316_s22 = scalar_lea.hbm %s1764_s7, 640 }
 0x447   : > { %p1313_p4 = scmp.ne.s32.totalorder %s1709_s14, %s1312_s18  ;;  %p1317_p9 = scmp.lt.u32.totalorder %s1709_s14, %s1764_s7 }
 0x448   : > { %p1318_p10 = scmp.lt.u32.totalorder %s1316_s22, %s1312_s18  ;;  %p1320_p12 = scmp.lt.u32.totalorder %s1312_s18, %s1709_s14 }
 0x449   : > { %p1314_p7 = pnand %p1313_p4, %p1447_p5 }
 0x44a   : > { %p1319_p11 = por %p1318_p10, %p1317_p9 }
 0x44b   : > { %p1315_p8 = pneg %p1314_p7 }
 0x44c   : > { %p1321_p13 = por %p1320_p12, %p1319_p11 }
 0x44e   : > { %p1322_p0 = pnand %p1321_p13, %p1315_p8 }
 0x450   : > { %1325 = shalt.err (!%p1322_p0)
}
 0x451   : > { %s1368_s13 = smov 4  }
 0x452   : > { %1219 = dma.vmem_to_hbm [thread:$0]  (%p1447_p5), %s1704_s23, 320, %s1709_s14, %s1714_s15, %s1362_s9, %s1362_s9, %s1368_s13  }
 0x453 PF: > { %p1225_p1 = scmp.ge.s32.totalorder %s1360_s27, 2  ;;  %s1076_s28 = sand.u32 1, %s1348_s24  }
 0x454   : > { %s1077_s16 = scalar_lea.sflag [#allocation3], %s1076_s28 }
 0x455   : > { %p1222_p2 = pnand %p1225_p1, %p1451_p6 }
 0x457   : > { %1343 = dma.done.wait (!%p1222_p2), %s1077_s16, 320  }
 0x458   : > { %1345 = vsyncadd (!%p1222_p2), %s1077_s16, 4294966976  ;;  %p17_p3 = scmp.ge.s32.totalorder %s1434_s30, 4   ;;  %s1767_s24 = smov %s1352_s25 }
 0x459   : > { %s1768_s25 = smov %s1356_s26  ;;  %s1769_s26 = smov %s1445_s10 }
 0x45a   : > { %s1770_s27 = smov %s1434_s30  ;;  %19 = sbr.rel (!%p17_p3) target bundleno = 3 (0x3), region = 83 }
 0x461   :  { %1082 = vsyncpa [#allocation3], 1 }
 0x462   :  { %1084 = vsyncpa [#allocation3 + $0x1], 1 }

</bundles_post_ra>
